<compile_context>
chip_gen: v6e
topology: v6e:2x2x1
jax: 0.10.0
libtpu: 0.0.40
codegen_flags: <defaults>
</compile_context>

<pallas_src>
import functools

import jax
import jax.numpy as jnp
from jax import lax
from jax.experimental import pallas as pl
from jax.experimental.pallas import tpu as pltpu


def _round_up(x, m):
    return (x + m - 1) // m * m


def _tpu_info():
    """(physical VMEM bytes or None, #TensorCores or 1) — best effort."""
    vmem_bytes, n_tc = None, 1
    try:
        info = pltpu.get_tpu_info()
        vmem_bytes = getattr(info, "vmem_capacity_bytes", None)
        for attr in ("num_cores", "core_count", "num_tensorcores",
                     "tensorcore_count", "cores_per_chip"):
            v = getattr(info, attr, None)
            if isinstance(v, int) and v > 0:
                n_tc = v
                break
    except Exception:   # query is best-effort; fall back to safe defaults
        pass
    return vmem_bytes, n_tc


def _pick_tm(m, cap, n_tc):
    """Largest multiple-of-8 divisor of m that is <= cap.

    Prefers multiples of 16 (bf16 sublane packing of the LHS rows) and, on
    2-TensorCore chips, softly prefers a divisor giving an even number of grid
    steps (balanced megacore split) if it costs < 25% in tile size.
    """
    cands = [d for d in range(8, min(cap, m) + 1, 8) if m % d == 0]
    if not cands:
        return None
    c16 = [d for d in cands if d % 16 == 0]
    pool = c16 if c16 else cands
    best = max(pool)
    if n_tc >= 2:
        even = [d for d in pool if (m // d) % 2 == 0 and 4 * d >= 3 * best]
        if even:
            best = max(even)
    return best


def _patch_embed_kernel(p_ref, w_ref, b_ref, g_ref, beta_ref, o_ref, *, eps):
    # p_ref: (tm, Kp) bf16 patches ; w_ref: (Kp, D) bf16 flattened conv weight
    # b_ref / g_ref / beta_ref: (1, D) f32 ; o_ref: (tm, D) f32
    x = jnp.dot(p_ref[...], w_ref[...], preferred_element_type=jnp.float32)
    x = x + b_ref[...]
    inv_d = 1.0 / x.shape[-1]
    mean = jnp.sum(x, axis=-1, keepdims=True) * inv_d
    xc = x - mean                                   # two-pass LN: stable
    var = jnp.sum(xc * xc, axis=-1, keepdims=True) * inv_d
    y = xc * lax.rsqrt(var + eps) * g_ref[...] + beta_ref[...]
    o_ref[...] = y.astype(o_ref.dtype)


def patch_embed_forward(x, conv_w, conv_b, ln_g, ln_b, *, patch_size,
                        eps=1e-5, tm_cap=1024, vmem_limit_bytes=None,
                        matmul_dtype=jnp.bfloat16):
    """x: (B, C, H, W) NCHW. Returns (y=(B, H'*W', D), (H', W')) like PyTorch."""
    B, C, H, W = x.shape
    ph = pw = patch_size
    assert H % ph == 0 and W % pw == 0
    Hp, Wp = H // ph, W // pw
    D = conv_w.shape[0]
    K = C * ph * pw
    Kp = _round_up(K, 16)              # clean bf16 packing on the contraction dim
    M = B * Hp * Wp

    # --- chip-aware scoped VMEM limit ---
    vmem_phys, n_tc = _tpu_info()
    if vmem_limit_bytes is None:
        if vmem_phys is not None and vmem_phys >= 100 * 1024 * 1024:
            vmem_limit_bytes = 96 * 1024 * 1024   # v5e / v6e (128 MiB physical)
        else:
            vmem_limit_bytes = 48 * 1024 * 1024   # v7x (64 MiB) or unknown

    # --- glue: im2col as ONE fused transpose + bf16 cast (no row pad) ---
    xp = x.reshape(B, C, Hp, ph, Wp, pw)
    xp = jnp.transpose(xp, (0, 2, 4, 1, 3, 5))         # (B, Hp, Wp, C, ph, pw)
    patches = xp.reshape(M, K).astype(matmul_dtype)    # (M, K) bf16
    if Kp != K:
        patches = jnp.pad(patches, ((0, 0), (0, Kp - K)))

    # conv weight (D, C, ph, pw) -> (Kp, D), matching the (c, kh, kw) order.
    w_mat = conv_w.reshape(D, K).T.astype(matmul_dtype)
    if Kp != K:
        w_mat = jnp.pad(w_mat, ((0, Kp - K), (0, 0)))
    b_row = conv_b.astype(jnp.float32).reshape(1, D)
    g_row = ln_g.astype(jnp.float32).reshape(1, D)
    beta_row = ln_b.astype(jnp.float32).reshape(1, D)

    # --- row-tile selection against an honest VMEM budget ---
    out_dtype = x.dtype
    out_b = jnp.dtype(out_dtype).itemsize
    in_b = jnp.dtype(matmul_dtype).itemsize
    budget = int(0.75 * vmem_limit_bytes)
    # Weight/param blocks have constant index_maps but are still double-buffered
    # by default (pl.Buffered(1) would free Kp*D*in_b more; left at default).
    fixed = 2 * Kp * D * in_b + 6 * D * 4 + (2 << 20)   # + 2 MiB slack
    per_row = (2 * Kp * in_b        # double-buffered patch rows
               + 2 * D * out_b      # double-buffered output rows
               + 4 * D * 4)         # ~4 f32 intermediates (acc, xc, xn, y)
    max_tm = (budget - fixed) // per_row
    if max_tm < 8:
        raise ValueError(
            f"PatchEmbed kernel: VMEM budget too small for K={Kp}, D={D} "
            f"(vmem_limit_bytes={vmem_limit_bytes}).")
    cap = min(tm_cap, (max_tm // 8) * 8)

    tm = _pick_tm(M, cap, n_tc)
    pad_rows = 0
    if tm is None:
        if M <= cap:
            tm = M                       # single full-extent step, no pad
        else:                            # rare fallback: pad rows + slice
            tm = cap
            pad_rows = _round_up(M, tm) - M
            patches = jnp.pad(patches, ((0, pad_rows), (0, 0)))
    Mp = M + pad_rows
    n_steps = Mp // tm

    kernel = functools.partial(_patch_embed_kernel, eps=eps)
    out = pl.pallas_call(
        kernel,
        out_shape=jax.ShapeDtypeStruct((Mp, D), out_dtype),
        grid_spec=pltpu.PrefetchScalarGridSpec(
            num_scalar_prefetch=0,
            grid=(n_steps,),
            in_specs=[
                pl.BlockSpec((tm, Kp), lambda i: (i, 0)),
                pl.BlockSpec((Kp, D), lambda i: (0, 0)),
                pl.BlockSpec((1, D), lambda i: (0, 0)),
                pl.BlockSpec((1, D), lambda i: (0, 0)),
                pl.BlockSpec((1, D), lambda i: (0, 0)),
            ],
            out_specs=pl.BlockSpec((tm, D), lambda i: (i, 0)),
        ),
        compiler_params=pltpu.CompilerParams(
            dimension_semantics=("parallel",),
            vmem_limit_bytes=vmem_limit_bytes),
    )(patches, w_mat, b_row, g_row, beta_row)

    if pad_rows:
        out = out[:M]
    y = out.reshape(B, Hp * Wp, D)
    return y, (Hp, Wp)


if __name__ == "__main__":
    # Small shapes consistent with the module: img=16, patch=4, C=4, dim=32.
    B, C, IMG, P, DIM = 2, 4, 16, 4, 32
    key = jax.random.PRNGKey(0)
    kx, kw, kb, kg, kbeta = jax.random.split(key, 5)

    x = jax.random.normal(kx, (B, C, IMG, IMG), dtype=jnp.float32)
    conv_w = jax.random.normal(kw, (DIM, C, P, P), dtype=jnp.float32) * 0.02
    conv_b = jax.random.normal(kb, (DIM,), dtype=jnp.float32) * 0.02
    ln_g = jnp.ones((DIM,), dtype=jnp.float32) + 0.1 * jax.random.normal(
        kg, (DIM,), dtype=jnp.float32)
    ln_b = 0.1 * jax.random.normal(kbeta, (DIM,), dtype=jnp.float32)

    fwd = jax.jit(functools.partial(patch_embed_forward, patch_size=P))
    y, (Hp, Wp) = fwd(x, conv_w, conv_b, ln_g, ln_b)
    y = jax.block_until_ready(y)

    # Sanity check vs pure-JAX f32 reference (loose tol: matmul runs in bf16).
    Hr, Wr = IMG // P, IMG // P
    xp = x.reshape(B, C, Hr, P, Wr, P).transpose(0, 2, 4, 1, 3, 5).reshape(
        B * Hr * Wr, C * P * P)
    ref = xp @ conv_w.reshape(DIM, -1).T + conv_b
    mu = ref.mean(-1, keepdims=True)
    var = ((ref - mu) ** 2).mean(-1, keepdims=True)
    ref = ((ref - mu) / jnp.sqrt(var + 1e-5)) * ln_g + ln_b
    ref = ref.reshape(B, Hr * Wr, DIM)

    assert y.shape == (B, Hr * Wr, DIM)
    assert int(Hp) == Hr and int(Wp) == Wr
    max_err = float(jnp.max(jnp.abs(y - ref)))
    assert max_err < 5e-2, f"max abs err {max_err}"

    print("KERNEL_OK")
</pallas_src>

<mosaic_0001>
module attributes {stable_mosaic.version = 11 : i64} {
  func.func @_patch_embed_kernel(%arg0: i32, %arg1: memref<32x64xbf16, #tpu.memory_space<vmem>>, %arg2: memref<64x32xbf16, #tpu.memory_space<vmem>>, %arg3: memref<1x32xf32, #tpu.memory_space<vmem>>, %arg4: memref<1x32xf32, #tpu.memory_space<vmem>>, %arg5: memref<1x32xf32, #tpu.memory_space<vmem>>, %arg6: memref<32x32xf32, #tpu.memory_space<vmem>>) attributes {dimension_semantics = [#tpu.dimension_semantics<parallel>], iteration_bounds = array<i64: 1>, scalar_prefetch = 0 : i64, scratch_operands = 0 : i64, tpu.core_type = #tpu.core_type<tc>, window_params = [{transform_indices = @transform_0, window_bounds = array<i64: 32, 64>}, {pipeline_mode = #tpu.pipeline_mode<synchronous>, transform_indices = @transform_1, window_bounds = array<i64: 64, 32>}, {pipeline_mode = #tpu.pipeline_mode<synchronous>, transform_indices = @transform_2, window_bounds = array<i64: 1, 32>}, {pipeline_mode = #tpu.pipeline_mode<synchronous>, transform_indices = @transform_3, window_bounds = array<i64: 1, 32>}, {pipeline_mode = #tpu.pipeline_mode<synchronous>, transform_indices = @transform_4, window_bounds = array<i64: 1, 32>}, {transform_indices = @transform_5, window_bounds = array<i64: 32, 32>}]} {
    %c0 = arith.constant 0 : index
    %c0_0 = arith.constant 0 : index
    %0 = vector.load %arg1[%c0, %c0_0] : memref<32x64xbf16, #tpu.memory_space<vmem>>, vector<32x64xbf16>
    %c0_1 = arith.constant 0 : index
    %c0_2 = arith.constant 0 : index
    %1 = vector.load %arg2[%c0_1, %c0_2] : memref<64x32xbf16, #tpu.memory_space<vmem>>, vector<64x32xbf16>
    %cst = arith.constant dense<0.000000e+00> : vector<32x32xf32>
    %2 = tpu.matmul %0, %1, %cst {dimension_numbers = #tpu.dot_dimension_numbers<[1], [0], [0], [1], [0, 0, 1, 1], [], []>} : vector<32x64xbf16>, vector<64x32xbf16>, vector<32x32xf32> -> vector<32x32xf32>
    %c0_3 = arith.constant 0 : index
    %c0_4 = arith.constant 0 : index
    %3 = vector.load %arg3[%c0_3, %c0_4] : memref<1x32xf32, #tpu.memory_space<vmem>>, vector<1x32xf32>
    %4 = vector.broadcast %3 : vector<1x32xf32> to vector<32x32xf32>
    %5 = arith.addf %2, %4 : vector<32x32xf32>
    %cst_5 = arith.constant dense<0.000000e+00> : vector<32xf32>
    %6 = vector.multi_reduction <add>, %5, %cst_5 [1] : vector<32x32xf32> to vector<32xf32>
    %7 = vector.shape_cast %6 : vector<32xf32> to vector<32x1xf32>
    %cst_6 = arith.constant 3.125000e-02 : f32
    %8 = vector.broadcast %cst_6 : f32 to vector<32x1xf32>
    %9 = arith.mulf %7, %8 : vector<32x1xf32>
    %10 = vector.broadcast %9 : vector<32x1xf32> to vector<32x32xf32>
    %11 = arith.subf %5, %10 : vector<32x32xf32>
    %12 = arith.mulf %11, %11 : vector<32x32xf32>
    %cst_7 = arith.constant dense<0.000000e+00> : vector<32xf32>
    %13 = vector.multi_reduction <add>, %12, %cst_7 [1] : vector<32x32xf32> to vector<32xf32>
    %14 = vector.shape_cast %13 : vector<32xf32> to vector<32x1xf32>
    %cst_8 = arith.constant 3.125000e-02 : f32
    %15 = vector.broadcast %cst_8 : f32 to vector<32x1xf32>
    %16 = arith.mulf %14, %15 : vector<32x1xf32>
    %cst_9 = arith.constant 9.99999974E-6 : f32
    %17 = vector.broadcast %cst_9 : f32 to vector<32x1xf32>
    %18 = arith.addf %16, %17 : vector<32x1xf32>
    %19 = math.rsqrt %18 : vector<32x1xf32>
    %20 = vector.broadcast %19 : vector<32x1xf32> to vector<32x32xf32>
    %21 = arith.mulf %11, %20 : vector<32x32xf32>
    %c0_10 = arith.constant 0 : index
    %c0_11 = arith.constant 0 : index
    %22 = vector.load %arg4[%c0_10, %c0_11] : memref<1x32xf32, #tpu.memory_space<vmem>>, vector<1x32xf32>
    %23 = vector.broadcast %22 : vector<1x32xf32> to vector<32x32xf32>
    %24 = arith.mulf %21, %23 : vector<32x32xf32>
    %c0_12 = arith.constant 0 : index
    %c0_13 = arith.constant 0 : index
    %25 = vector.load %arg5[%c0_12, %c0_13] : memref<1x32xf32, #tpu.memory_space<vmem>>, vector<1x32xf32>
    %26 = vector.broadcast %25 : vector<1x32xf32> to vector<32x32xf32>
    %27 = arith.addf %24, %26 : vector<32x32xf32>
    %c0_14 = arith.constant 0 : index
    %c0_15 = arith.constant 0 : index
    %28 = vector.load %arg6[%c0_14, %c0_15] : memref<32x32xf32, #tpu.memory_space<vmem>>, vector<32x32xf32>
    tpu.vector_store %arg6[%c0_14, %c0_15], %27 {strides = array<i32>} : memref<32x32xf32, #tpu.memory_space<vmem>>, vector<32x32xf32>,
    return
  }
  func.func @transform_0(%arg0: i32) -> (i32, i32) {
    %c0_i32 = arith.constant 0 : i32
    %c0_i32_0 = arith.constant 0 : i32
    return %arg0, %c0_i32 : i32, i32
  }
  func.func @transform_1(%arg0: i32) -> (i32, i32) {
    %c0_i32 = arith.constant 0 : i32
    %c0_i32_0 = arith.constant 0 : i32
    %c0_i32_1 = arith.constant 0 : i32
    return %c0_i32, %c0_i32_0 : i32, i32
  }
  func.func @transform_2(%arg0: i32) -> (i32, i32) {
    %c0_i32 = arith.constant 0 : i32
    %c0_i32_0 = arith.constant 0 : i32
    %c0_i32_1 = arith.constant 0 : i32
    return %c0_i32, %c0_i32_0 : i32, i32
  }
  func.func @transform_3(%arg0: i32) -> (i32, i32) {
    %c0_i32 = arith.constant 0 : i32
    %c0_i32_0 = arith.constant 0 : i32
    %c0_i32_1 = arith.constant 0 : i32
    return %c0_i32, %c0_i32_0 : i32, i32
  }
  func.func @transform_4(%arg0: i32) -> (i32, i32) {
    %c0_i32 = arith.constant 0 : i32
    %c0_i32_0 = arith.constant 0 : i32
    %c0_i32_1 = arith.constant 0 : i32
    return %c0_i32, %c0_i32_0 : i32, i32
  }
  func.func @transform_5(%arg0: i32) -> (i32, i32) {
    %c0_i32 = arith.constant 0 : i32
    %c0_i32_0 = arith.constant 0 : i32
    return %arg0, %c0_i32 : i32, i32
  }
}

</mosaic_0001>

<bundles_post_ra>
// kernel: patch_embed_forward.1
= control target key start
LH: loop header
LB: loop body
LE: loop exit
PB: predicated region body
PF: predicated region fallthrough
CT: control target
= control target key end

     0   :  { %vm75_vm0 = vcmask 523264   ;;  %s369_s0 = inlined_call_operand.vmem [shape: bf16[32,64], index: 0, kind: input, shape index: {}]   ;;  %s370_s1 = inlined_call_operand.vmem [shape: bf16[64,32], index: 1, kind: input, shape index: {}]   ;;  %s371_s2 = inlined_call_operand.vmem [shape: f32[1,32], index: 2, kind: input, shape index: {}]   ;;  %s372_s3 = inlined_call_operand.vmem [shape: f32[1,32], index: 3, kind: input, shape index: {}]   ;;  %s373_s4 = inlined_call_operand.vmem [shape: f32[1,32], index: 4, kind: input, shape index: {}]   ;;  %s374_s5 = inlined_call_operand.hbm [shape: f32[32,32], index: 5, kind: output, shape index: {}]  }
   0x1   :  { %v258_v0 = vld [vmem:[%s370_s1 + $0x18] sm:$0xff]   ;;  %v259_v1 = vld [vmem:[%s370_s1 + $0x10] sm:$0xff]   ;;  %v260_v2 = vld [vmem:[%s370_s1 + $0x8] sm:$0xff]  }
   0x2   :  { %243 = vmatprep.subr.bf16.mxu0 %v258_v0  ;;  %v262_v3 = vld [vmem:[%s369_s0] sm:$0xff]  }
   0x3   :  { %244 = vmatpush3.bf16.msra.mxu0 %v258_v0  ;;  %251 = vmatprep.mubr.msk.bf16.mxu0 %vm75_vm0, %v262_v3 }
   0x4   :  { %245 = vmatprep.subr.bf16.mxu0 %v259_v1 }
   0x5   :  { %10 = vsyncpa [#allocation3], 0  ;;  %v261_v4 = vld [vmem:[%s370_s1] sm:$0xff]   ;;  %v263_v5 = vld [vmem:[%s369_s0 + $0x8] sm:$0xff]   ;;  %vm131_vm1 = vcmask 261120  }
   0x6   :  { %v226_v6 = vld [vmem:[%s371_s2] ss:$0 sm:$0xff] }
   0x7   :  { %246 = vmatpush3.bf16.msra.mxu0 %v259_v1  ;;  %v235_v52 = vld [vmem:[%s372_s3] ss:$0 sm:$0xff]  ;;  %s294_s3 = smov [#allocation2]  }
   0x8   :  { %247 = vmatprep.subr.bf16.mxu0 %v260_v2  ;;  %v236_v54 = vld [vmem:[%s373_s4] ss:$0 sm:$0xff]  ;;  %s215_s8 = sshll.u32 %s294_s3, 4  ;;  %s216_s8 = int_to_ptr.vmem [resolvable:$true] %s215_s8 }
   0x9   :  { %s272_s4 = scalar_lea.vmem %s216_s8, 512  ;;  %p277_p1 = scmp.lt.s32.totalorder %s216_s8, %s216_s8 }
   0xa   :  { %p273_p0 = scmp.ne.s32.totalorder %s216_s8, %s272_s4  ;;  %p278_p2 = scmp.lt.s32.totalorder %s272_s4, %s272_s4 }
   0xb   :  { %248 = vmatpush3.bf16.msra.mxu0 %v260_v2 }
   0xc   :  { %249 = vmatprep.subr.bf16.mxu0 %v261_v4  ;;  %p279_p3 = por %p278_p2, %p277_p1 }
   0xe   :  { %p280_p4 = pnand %p279_p3, %p273_p0 }
   0xf   :  { %250 = vmatpush3.bf16.msra.mxu0 %v261_v4 }
  0x12   :  { %252 = vmatmul.mubr.msk.bf16.vlgmr.msra.gmra.mxu0 %vm75_vm0, %v263_v5 }
  0xd2   :  { %v253_v7 = vpop.f32.mrf.mxu0 }
  0xd3   :  { %v125_v8 = vadd.f32 %v253_v7, %v226_v6 }
  0xd4   :  { %v116_v9 = vpop.f32.mrf.mxu0 }
  0xd5   :  { %v117_v10 = vadd.f32 %v226_v6, %v116_v9  ;;  %v138_v11 = vsel %vm131_vm1, %v125_v8, 0.0 }
  0xd6   :  { %139 = vadd.xlane.f32.xlu1 %v138_v11  ;;  %v254_v12 = vpop.f32.mrf.mxu0 }
  0xd7   :  { %v128_v13 = vadd.f32 %v254_v12, %v226_v6  ;;  %v132_v14 = vsel %vm131_vm1, %v117_v10, 0.0 }
  0xd8   :  { %v119_v15 = vpop.f32.mrf.mxu0  ;;  %133 = vadd.xlane.f32.xlu0 %v132_v14 }
  0xd9   :  { %v120_v16 = vadd.f32 %v226_v6, %v119_v15  ;;  %v141_v17 = vsel %vm131_vm1, %v128_v13, 0.0 }
  0xda   :  { %142 = vadd.xlane.f32.xlu1 %v141_v17 }
  0xdb   :  { %v135_v18 = vsel %vm131_vm1, %v120_v16, 0.0 }
  0xdc   :  { %136 = vadd.xlane.f32.xlu0 %v135_v18 }
 0x15f   :  { %v140_v19 = vpop.xlane.xlu1 %139 }
 0x160   :  { %v146_v20 = vmul.f32 0.03125, %v140_v19 }
 0x161   :  { %v134_v21 = vpop.xlane.xlu0 %133 }
 0x162   :  { %v144_v22 = vmul.f32 0.03125, %v134_v21  ;;  %v150_v24 = vsub.f32 %v125_v8, %v146_v20 }
 0x163   :  { %v143_v23 = vpop.xlane.xlu1 %142 }
 0x164   :  { %v148_v25 = vsub.f32 %v117_v10, %v144_v22  ;;  %v147_v26 = vmul.f32 0.03125, %v143_v23  ;;  %v154_v33 = vmul.f32 %v150_v24, %v150_v24 }
 0x165   :  { %v137_v27 = vpop.xlane.xlu0 %136 }
 0x166   :  { %v145_v28 = vmul.f32 0.03125, %v137_v27  ;;  %v152_v29 = vmul.f32 %v148_v25, %v148_v25  ;;  %v151_v30 = vsub.f32 %v128_v13, %v147_v26  ;;  %v162_v35 = vsel %vm131_vm1, %v154_v33, 0.0 }
 0x168   :  { %v149_v31 = vsub.f32 %v120_v16, %v145_v28  ;;  %v156_v32 = vsel %vm131_vm1, %v152_v29, 0.0  ;;  %v155_v37 = vmul.f32 %v151_v30, %v151_v30 }
 0x169   :  { %157 = vadd.xlane.f32.xlu0 %v156_v32 }
 0x16a   :  { %v153_v34 = vmul.f32 %v149_v31, %v149_v31  ;;  %v165_v38 = vsel %vm131_vm1, %v155_v37, 0.0 }
 0x16c   :  { %v159_v36 = vsel %vm131_vm1, %v153_v34, 0.0 }
 0x16d   :  { %163 = vadd.xlane.f32.xlu0 %v162_v35  ;;  %160 = vadd.xlane.f32.xlu1 %v159_v36 }
 0x171   :  { %166 = vadd.xlane.f32.xlu1 %v165_v38 }
 0x1f2   :  { %v158_v39 = vpop.xlane.xlu0 %157 }
 0x1f3   :  { %v168_v40 = vmul.f32 0.03125, %v158_v39 }
 0x1f5   :  { %v172_v41 = vadd.f32 1e-05, %v168_v40 }
 0x1f6   :  { %v161_v42 = vpop.xlane.xlu1 %160  ;;  %v164_v43 = vpop.xlane.xlu0 %163 }
 0x1f7   :  { %264 = vrsqrt.f32 %v172_v41  ;;  %v169_v44 = vmul.f32 0.03125, %v161_v42  ;;  %v170_v45 = vmul.f32 0.03125, %v164_v43 }
 0x1f9   :  { %v173_v46 = vadd.f32 1e-05, %v169_v44  ;;  %v174_v47 = vadd.f32 1e-05, %v170_v45 }
 0x1fa   :  { %v167_v48 = vpop.xlane.xlu1 %166 }
 0x1fb   :  { %266 = vrsqrt.f32 %v173_v46  ;;  %v171_v49 = vmul.f32 0.03125, %v167_v48 }
 0x1fc   :  { %268 = vrsqrt.f32 %v174_v47 }
 0x1fd   :  { %v175_v50 = vadd.f32 1e-05, %v171_v49 }
 0x1ff   :  { %270 = vrsqrt.f32 %v175_v50 }
 0x204   :  { %v265_v51 = vpop.eup %264 }
 0x205   :  { %v180_v53 = vmul.f32 %v265_v51, %v148_v25 }
 0x207   :  { %v191_v55 = vmul.f32 %v235_v52, %v180_v53 }
 0x208   :  { %v267_v56 = vpop.eup %266 }
 0x209   :  { %v269_v57 = vpop.eup %268  ;;  %v181_v58 = vmul.f32 %v267_v56, %v149_v31  ;;  %v202_v59 = vadd.f32 %v236_v54, %v191_v55 }
 0x20a   :  { %v182_v60 = vmul.f32 %v269_v57, %v150_v24 }
 0x20b   :  { %v192_v61 = vmul.f32 %v235_v52, %v181_v58  ;;  %206 = vst.msk [vmem:[#allocation2] sm:$0xff] %vm131_vm1, %v202_v59 }
 0x20c   :  { %v271_v62 = vpop.eup %270  ;;  %v193_v63 = vmul.f32 %v235_v52, %v182_v60 }
 0x20d   :  { %v183_v0 = vmul.f32 %v271_v62, %v151_v30  ;;  %v203_v1 = vadd.f32 %v236_v54, %v192_v61 }
 0x20e   :  { %v204_v2 = vadd.f32 %v236_v54, %v193_v63 }
 0x20f   :  { %v194_v3 = vmul.f32 %v235_v52, %v183_v0  ;;  %207 = vst.msk [vmem:[#allocation2 + $0x8] sm:$0xff] %vm131_vm1, %v203_v1 }
 0x210   :  { %208 = vst.msk [vmem:[#allocation2 + $0x10] sm:$0xff] %vm131_vm1, %v204_v2 }
 0x211   :  { %v205_v4 = vadd.f32 %v236_v54, %v194_v3 }
 0x213   :  { %209 = vst.msk [vmem:[#allocation2 + $0x18] sm:$0xff] %vm131_vm1, %v205_v4 }
 0x214   :  { %283 = shalt.err (!%p280_p4)
}
 0x215   :  { %s295_s9 = smov 128   ;;  %s296_s10 = smov 8  }
 0x216   :  { %221 = dma.vmem_to_hbm [thread:$0]  %s216_s8, 512, %s374_s5, [#allocation3], %s295_s9, %s295_s9, %s296_s10  }
 0x217   :  { %292 = dma.done.wait [#allocation3], 512  }
 0x218   :  { %293 = vsyncadd [#allocation3], 4294966784 }
 0x219   :  { %225 = vsyncpa [#allocation3], 1 }

</bundles_post_ra>
